<compile_context>
chip_gen: v5e
topology: v5e:2x2
jax: 0.10.0
libtpu: 0.0.40
codegen_flags: <defaults>
</compile_context>

<pallas_src>
import functools

import jax
import jax.numpy as jnp
from jax import lax
from jax.experimental import pallas as pl
from jax.experimental.pallas import tpu as pltpu


_MASK_VALUE = -1e30   # exp(_MASK_VALUE) underflows to exactly 0.0 in f32 (no inf/nan)
_EPS2 = 1e-24         # (F.normalize eps = 1e-12)^2
_MAX_SCALE = 60.0     # exp(scale) * N must stay finite in f32 (no running max is used)


def _round_up(n, m):
    return ((n + m - 1) // m) * m


def _choose_tile(n, max_tile, align):
    """Largest tile t <= max_tile with n % t == 0 and t a multiple of `align`.
    Falls back to the full extent (always a legal block shape). Used where the
    data cannot be zero-padded (attention sequence axis)."""
    if n <= max_tile:
        return n
    t = (max_tile // align) * align
    while t >= align:
        if n % t == 0:
            return t
        t -= align
    return n


def _tile_and_pad(n, max_tile, align):
    """(tile, padded_extent). Full-extent block if n is small, otherwise an
    aligned tile with n padded up to a multiple of it (zero padding is harmless
    for the matmuls below)."""
    if n <= max_tile:
        return n, n
    t = max(align, (max_tile // align) * align)
    return t, _round_up(n, t)


# ----------------------------------------------------------------------------
# Tiled linear:  y = x @ w.T   (w kept in torch (out_features, in_features) layout)
# ----------------------------------------------------------------------------
def _linear_nt_kernel(x_ref, w_ref, o_ref, acc_ref):
    # x_ref: (tm, tk), w_ref: (tn, tk) -> (tm, tn); contract the last dim of both
    # operands (MXU-native "NT" matmul, no transposed copy of w).
    @pl.when(pl.program_id(2) == 0)
    def _init():
        acc_ref[...] = jnp.zeros_like(acc_ref)

    acc_ref[...] += lax.dot_general(
        x_ref[...], w_ref[...],
        dimension_numbers=(((1,), (1,)), ((), ())),
        preferred_element_type=jnp.float32,
    )

    @pl.when(pl.program_id(2) == pl.num_programs(2) - 1)
    def _finalize():
        o_ref[...] = acc_ref[...].astype(o_ref.dtype)


def pallas_linear(x, w, *, out_dtype=None,
                  block_m=256, block_n=512, block_k=512):
    """x: (M, K); w: (N_out, K) torch layout. Returns x @ w.T."""
    M, K = x.shape
    N, K2 = w.shape
    assert K == K2
    out_dtype = x.dtype if out_dtype is None else out_dtype

    align_m = 16 if x.dtype == jnp.bfloat16 else 8   # dtype-aware sublane alignment
    tm, Mp = _tile_and_pad(M, block_m, align_m)
    tn, Np = _tile_and_pad(N, block_n, 128)           # lane-dense output tile
    tk, Kp = _tile_and_pad(K, block_k, 128)           # K-tiled contraction (v7x VMEM safe)

    if (Mp, Kp) != (M, K):
        x = jnp.pad(x, ((0, Mp - M), (0, Kp - K)))
    if (Np, Kp) != (N, K):
        w = jnp.pad(w, ((0, Np - N), (0, Kp - K)))

    out = pl.pallas_call(
        _linear_nt_kernel,
        out_shape=jax.ShapeDtypeStruct((Mp, Np), out_dtype),
        grid=(Mp // tm, Np // tn, Kp // tk),
        in_specs=[
            pl.BlockSpec((tm, tk), lambda i, j, kk: (i, kk)),
            pl.BlockSpec((tn, tk), lambda i, j, kk: (j, kk)),
        ],
        out_specs=pl.BlockSpec((tm, tn), lambda i, j, kk: (i, j)),
        scratch_shapes=[pltpu.VMEM((tm, tn), jnp.float32)],
        compiler_params=pltpu.CompilerParams(
            dimension_semantics=("parallel", "parallel", "arbitrary"),
            vmem_limit_bytes=48 * 1024 * 1024),
    )(x, w)
    if (Mp, Np) != (M, N):
        out = out[:M, :N]
    return out


# ----------------------------------------------------------------------------
# L2-normalize the last (head) dim — pre-pass for K so the attention inner loop
# never re-normalizes K tiles.
# ----------------------------------------------------------------------------
def _l2norm_kernel(x_ref, o_ref):
    x = x_ref[...].astype(jnp.float32)
    inv = lax.rsqrt(jnp.maximum(jnp.sum(x * x, axis=-1, keepdims=True), _EPS2))
    o_ref[...] = (x * inv).astype(o_ref.dtype)


def pallas_l2_normalize(x, *, block=512):
    """x: (B, H, N, D) -> x / max(||x||_2, 1e-12) along D."""
    B, H, N, D = x.shape
    align = 16 if x.dtype == jnp.bfloat16 else 8
    t = _choose_tile(N, block, align)
    spec = pl.BlockSpec((1, H, t, D), lambda b, i: (b, 0, i, 0))
    return pl.pallas_call(
        _l2norm_kernel,
        out_shape=jax.ShapeDtypeStruct(x.shape, x.dtype),
        grid=(B, N // t),
        in_specs=[spec],
        out_specs=spec,
        compiler_params=pltpu.CompilerParams(
            dimension_semantics=("parallel", "parallel")),
    )(x)


# ----------------------------------------------------------------------------
# Flash-style causal cosine-sim attention (all heads batched per grid step).
# Expects k ALREADY L2-normalized (pallas_l2_normalize); q is normalized and
# scaled in-kernel, exactly once per q tile.
# ----------------------------------------------------------------------------
def _flash_cosine_attn_kernel(q_ref, k_ref, v_ref, o_ref,
                              qn_ref, acc_ref, l_ref, *, scale):
    qi = pl.program_id(1)
    ki = pl.program_id(2)

    @pl.when(ki == 0)
    def _init():
        acc_ref[...] = jnp.zeros_like(acc_ref)
        l_ref[...] = jnp.zeros_like(l_ref)
        # L2-normalize + scale q ONCE per q tile (hoisted out of the kv loop).
        q = q_ref[0].astype(jnp.float32)                             # (H, tq, D)
        inv = lax.rsqrt(jnp.maximum(jnp.sum(q * q, -1, keepdims=True), _EPS2))
        qn_ref[...] = (q * (inv * scale)).astype(qn_ref.dtype)

    # Causal block skipping: kv tiles strictly above the diagonal contribute
    # nothing; their DMAs are also skipped (the kv index map clamps to the
    # diagonal so the resident block is simply reused).
    @pl.when(ki <= qi)
    def _compute():
        # q @ k^T per head, batched over heads on the MXU (k pre-normalized).
        s = jnp.einsum("hqd,hkd->hqk", qn_ref[...], k_ref[0],
                       preferred_element_type=jnp.float32)           # (H, tq, tk) f32

        def _accumulate(p):
            # TODO(synk): l could ride the idle MXU via a matmul against a
            # resident ones vector instead of this cross-lane reduce.
            l_ref[...] += jnp.sum(p, axis=-1, keepdims=True)
            acc_ref[...] += jnp.einsum("hqk,hkd->hqd",
                                       p.astype(v_ref.dtype), v_ref[0],
                                       preferred_element_type=jnp.float32)

        # Scores are bounded (|s| <= scale) so no running max is needed: exp()
        # cannot overflow, and masked entries underflow to exactly 0.
        @pl.when(ki < qi)
        def _below_diag():        # fully unmasked tile: no iota / select at all
            _accumulate(jnp.exp(s))

        @pl.when(ki == qi)
        def _diag():              # only the diagonal tile needs the causal mask
            row = lax.broadcasted_iota(jnp.int32, s.shape, 1)
            col = lax.broadcasted_iota(jnp.int32, s.shape, 2)
            _accumulate(jnp.exp(jnp.where(col > row, _MASK_VALUE, s)))

    @pl.when(ki == pl.num_programs(2) - 1)
    def _finalize():
        # EUP approx reciprocal (free slot) when the output is low precision;
        # exact reciprocal for f32 outputs.
        approx = o_ref.dtype != jnp.float32
        inv_l = pl.reciprocal(l_ref[...], approx=approx)
        o_ref[0] = (acc_ref[...] * inv_l).astype(o_ref.dtype)


def pallas_flash_cosine_sim_attention(q, k_normed, v, *, scale, block=512):
    """q, k_normed, v: (B, H, N, D). Causal cosine-sim attention, flash tiling.

    All H heads are processed per grid step (batched einsum) so the per-step
    MXU work is H times larger and the grid has H times fewer iterations.
    """
    B, H, N, D = q.shape
    align = 16 if q.dtype == jnp.bfloat16 else 8
    t = _choose_tile(N, block, align)   # square q/kv tiles -> diagonal test is ki == qi
    # TODO(synk): at dim_head < 128 the last block dim is lane-sparse (masked
    # output stores, underfed MXU contraction); a fully lane-dense (t, H*D)
    # packing needs in-kernel head reshapes and is left for a follow-up.
    kernel = functools.partial(_flash_cosine_attn_kernel, scale=scale)
    q_map = lambda b, i, j: (b, 0, i, 0)
    # Clamp the kv block index to the diagonal: for j > i the index equals the
    # previous step's, so Pallas re-uses the resident block and issues NO DMA.
    kv_map = lambda b, i, j: (b, 0, jnp.minimum(i, j), 0)
    # TODO(synk): pipeline_mode=pl.Buffered(3) on the k/v specs is a further
    # knob to hide DMA latency behind the short compute body.
    return pl.pallas_call(
        kernel,
        out_shape=jax.ShapeDtypeStruct((B, H, N, D), q.dtype),
        grid=(B, N // t, N // t),
        in_specs=[
            pl.BlockSpec((1, H, t, D), q_map),
            pl.BlockSpec((1, H, t, D), kv_map),
            pl.BlockSpec((1, H, t, D), kv_map),
        ],
        # Output block constant over the kv axis -> stays resident while we accumulate.
        out_specs=pl.BlockSpec((1, H, t, D), q_map),
        scratch_shapes=[
            pltpu.VMEM((H, t, D), q.dtype),       # normalized+scaled q (MXU operand dtype)
            pltpu.VMEM((H, t, D), jnp.float32),   # output accumulator
            pltpu.VMEM((H, t, 1), jnp.float32),   # softmax denominator
        ],
        compiler_params=pltpu.CompilerParams(
            dimension_semantics=("parallel", "parallel", "arbitrary")),
    )(q, k_normed, v)


# ----------------------------------------------------------------------------
# Module wrapper (plain-JAX glue: weight concat, head split/merge)
# ----------------------------------------------------------------------------
def attention_forward(x, params, *, heads, scale,
                      compute_dtype=jnp.float32, seq_block=512):
    """x: (B, N, dim). params: torch-layout weights
       to_q/to_k/to_v: (inner, dim), to_out: (dim, inner).
       compute_dtype=jnp.bfloat16 selects bf16 MXU operands (valid on v5e/v6e/v7x);
       softmax / normalization math always stays in f32."""
    if scale > _MAX_SCALE:
        raise ValueError(
            f"scale={scale} > {_MAX_SCALE}: the no-running-max softmax relies on "
            "exp(scale)*N staying finite in float32.")
    B, N, dim = x.shape
    inner = params["to_q"].shape[0]
    d_head = inner // heads
    cd = compute_dtype

    # Fused q/k/v projection: x read once, single lane-dense (3*inner) output.
    # NOTE: in a real module the concatenated weight would be built once at init.
    w_qkv = jnp.concatenate([params["to_q"], params["to_k"], params["to_v"]], axis=0)

    x_flat = x.reshape(B * N, dim).astype(cd)
    qkv = pallas_linear(x_flat, w_qkv.astype(cd), out_dtype=cd)   # (B*N, 3*inner)
    q, k, v = jnp.split(qkv, 3, axis=-1)

    # TODO(synk): the split/merge transposes below are whole-tensor HBM round
    # trips; they could be removed by reading q/k/v directly from the (B,N,3*inner)
    # projection output via lane-offset index maps inside the attention kernel.
    def split_heads(t):  # (B*N, inner) -> (B, H, N, D)   [layout glue]
        return t.reshape(B, N, heads, d_head).transpose(0, 2, 1, 3)

    q, k, v = split_heads(q), split_heads(k), split_heads(v)
    k = pallas_l2_normalize(k, block=seq_block)   # normalize K once (pre-pass)

    o = pallas_flash_cosine_sim_attention(q, k, v, scale=scale, block=seq_block)

    o = o.transpose(0, 2, 1, 3).reshape(B * N, inner)             # merge heads (glue)
    out = pallas_linear(o, params["to_out"].astype(cd), out_dtype=x.dtype)
    return out.reshape(B, N, dim)


# ----------------------------------------------------------------------------
# Pure-JAX reference (sanity check)
# ----------------------------------------------------------------------------
def reference_forward(x, params, *, heads, scale):
    B, N, dim = x.shape
    inner = params["to_q"].shape[0]
    d_head = inner // heads
    q = x @ params["to_q"].T
    k = x @ params["to_k"].T
    v = x @ params["to_v"].T
    sh = lambda t: t.reshape(B, N, heads, d_head).transpose(0, 2, 1, 3)
    q, k, v = sh(q), sh(k), sh(v)
    nrm = lambda t: t / jnp.maximum(jnp.linalg.norm(t, axis=-1, keepdims=True), 1e-12)
    q, k = nrm(q), nrm(k)
    sim = jnp.einsum("bhid,bhjd->bhij", q, k) * scale
    mask = jnp.triu(jnp.ones((N, N), dtype=bool), 1)
    sim = jnp.where(mask, -jnp.finfo(jnp.float32).max, sim)
    attn = jax.nn.softmax(sim, axis=-1)
    o = jnp.einsum("bhij,bhjd->bhid", attn, v)
    o = o.transpose(0, 2, 1, 3).reshape(B, N, inner)
    return o @ params["to_out"].T


# ----------------------------------------------------------------------------
if __name__ == "__main__":
    def make_params(key, dim, inner):
        kq, kk, kv, ko = jax.random.split(key, 4)
        return {
            "to_q": jax.random.normal(kq, (inner, dim), jnp.float32) * 0.1,
            "to_k": jax.random.normal(kk, (inner, dim), jnp.float32) * 0.1,
            "to_v": jax.random.normal(kv, (inner, dim), jnp.float32) * 0.1,
            "to_out": jax.random.normal(ko, (dim, inner), jnp.float32) * 0.1,
        }

    root = jax.random.PRNGKey(0)

    # Config 1: small shapes consistent with the module.
    k1, k1p = jax.random.split(jax.random.fold_in(root, 1))
    batch, seq, dim, heads, dim_head, scale = 2, 8, 32, 4, 16, 8
    inner = heads * dim_head
    x1 = jax.random.normal(k1, (batch, seq, dim), jnp.float32)
    p1 = make_params(k1p, dim, inner)
    out1 = jax.block_until_ready(attention_forward(x1, p1, heads=heads, scale=scale))
    ref1 = reference_forward(x1, p1, heads=heads, scale=scale)
    assert out1.shape == (batch, seq, dim)
    assert jnp.allclose(out1, ref1, atol=2e-3, rtol=2e-3), \
        float(jnp.max(jnp.abs(out1 - ref1)))

    # Config 2: longer sequence with a small block so the flash accumulation,
    # the clamped (DMA-skipping) kv index map and the diagonal-mask path are
    # actually exercised (4x4 kv grid).
    k2, k2p = jax.random.split(jax.random.fold_in(root, 2))
    b2, n2, d2, h2, dh2 = 1, 64, 32, 2, 16
    x2 = jax.random.normal(k2, (b2, n2, d2), jnp.float32)
    p2 = make_params(k2p, d2, h2 * dh2)
    out2 = jax.block_until_ready(
        attention_forward(x2, p2, heads=h2, scale=scale, seq_block=16))
    ref2 = reference_forward(x2, p2, heads=h2, scale=scale)
    assert jnp.allclose(out2, ref2, atol=2e-3, rtol=2e-3), \
        float(jnp.max(jnp.abs(out2 - ref2)))

    # Config 1 again on the bf16 MXU-operand path (valid on v5e/v6e/v7x),
    # f32 accumulation inside the kernels; looser tolerance for bf16 operands.
    out1_bf16 = jax.block_until_ready(
        attention_forward(x1, p1, heads=heads, scale=scale,
                          compute_dtype=jnp.bfloat16))
    assert jnp.allclose(out1_bf16.astype(jnp.float32), ref1, atol=1e-1, rtol=1e-1)

    print("KERNEL_OK")
</pallas_src>

<mosaic_0001>
module attributes {stable_mosaic.version = 11 : i64} {
  func.func @_linear_nt_kernel(%arg0: i32, %arg1: i32, %arg2: i32, %arg3: memref<16x32xf32, #tpu.memory_space<vmem>>, %arg4: memref<192x32xf32, #tpu.memory_space<vmem>>, %arg5: memref<16x192xf32, #tpu.memory_space<vmem>>, %arg6: memref<16x192xf32, #tpu.memory_space<vmem>>) attributes {dimension_semantics = [#tpu.dimension_semantics<parallel>, #tpu.dimension_semantics<parallel>, #tpu.dimension_semantics<arbitrary>], iteration_bounds = array<i64: 1, 1, 1>, scalar_prefetch = 0 : i64, scratch_operands = 1 : i64, tpu.core_type = #tpu.core_type<tc>, window_params = [{transform_indices = @transform_0, window_bounds = array<i64: 16, 32>}, {transform_indices = @transform_1, window_bounds = array<i64: 192, 32>}, {transform_indices = @transform_2, window_bounds = array<i64: 16, 192>}]} {
    %c0_i32 = arith.constant 0 : i32
    %0 = arith.cmpi eq, %arg2, %c0_i32 : i32
    %1 = arith.extui %0 : i1 to i32
    %c0_i32_0 = arith.constant 0 : i32
    %2 = arith.cmpi ne, %1, %c0_i32_0 : i32
    scf.if %2 {
      %cst_10 = arith.constant 0.000000e+00 : f32
      %12 = vector.broadcast %cst_10 : f32 to vector<16x192xf32>
      %c0_11 = arith.constant 0 : index
      %c0_12 = arith.constant 0 : index
      %13 = vector.load %arg6[%c0_11, %c0_12] : memref<16x192xf32, #tpu.memory_space<vmem>>, vector<16x192xf32>
      tpu.vector_store %arg6[%c0_11, %c0_12], %12 {strides = array<i32>} : memref<16x192xf32, #tpu.memory_space<vmem>>, vector<16x192xf32>,
    } else {
    }
    %c0 = arith.constant 0 : index
    %c0_1 = arith.constant 0 : index
    %3 = vector.load %arg6[%c0, %c0_1] : memref<16x192xf32, #tpu.memory_space<vmem>>, vector<16x192xf32>
    %c0_2 = arith.constant 0 : index
    %c0_3 = arith.constant 0 : index
    %4 = vector.load %arg3[%c0_2, %c0_3] : memref<16x32xf32, #tpu.memory_space<vmem>>, vector<16x32xf32>
    %c0_4 = arith.constant 0 : index
    %c0_5 = arith.constant 0 : index
    %5 = vector.load %arg4[%c0_4, %c0_5] : memref<192x32xf32, #tpu.memory_space<vmem>>, vector<192x32xf32>
    %cst = arith.constant dense<0.000000e+00> : vector<16x192xf32>
    %6 = tpu.matmul %4, %5, %cst {dimension_numbers = #tpu.dot_dimension_numbers<[1], [1], [0], [0], [0, 0, 1, 0], [], []>} : vector<16x32xf32>, vector<192x32xf32>, vector<16x192xf32> -> vector<16x192xf32>
    %7 = arith.addf %3, %6 : vector<16x192xf32>
    %c0_6 = arith.constant 0 : index
    %c0_7 = arith.constant 0 : index
    %8 = vector.load %arg6[%c0_6, %c0_7] : memref<16x192xf32, #tpu.memory_space<vmem>>, vector<16x192xf32>
    tpu.vector_store %arg6[%c0_6, %c0_7], %7 {strides = array<i32>} : memref<16x192xf32, #tpu.memory_space<vmem>>, vector<16x192xf32>,
    %c0_i32_8 = arith.constant 0 : i32
    %9 = arith.cmpi eq, %arg2, %c0_i32_8 : i32
    %10 = arith.extui %9 : i1 to i32
    %c0_i32_9 = arith.constant 0 : i32
    %11 = arith.cmpi ne, %10, %c0_i32_9 : i32
    scf.if %11 {
      %c0_10 = arith.constant 0 : index
      %c0_11 = arith.constant 0 : index
      %12 = vector.load %arg6[%c0_10, %c0_11] : memref<16x192xf32, #tpu.memory_space<vmem>>, vector<16x192xf32>
      %c0_12 = arith.constant 0 : index
      %c0_13 = arith.constant 0 : index
      %13 = vector.load %arg5[%c0_12, %c0_13] : memref<16x192xf32, #tpu.memory_space<vmem>>, vector<16x192xf32>
      tpu.vector_store %arg5[%c0_12, %c0_13], %12 {strides = array<i32>} : memref<16x192xf32, #tpu.memory_space<vmem>>, vector<16x192xf32>,
    } else {
    }
    return
  }
  func.func @transform_0(%arg0: i32, %arg1: i32, %arg2: i32) -> (i32, i32) {
    %c0_i32 = arith.constant 0 : i32
    return %arg0, %arg2 : i32, i32
  }
  func.func @transform_1(%arg0: i32, %arg1: i32, %arg2: i32) -> (i32, i32) {
    %c0_i32 = arith.constant 0 : i32
    return %arg1, %arg2 : i32, i32
  }
  func.func @transform_2(%arg0: i32, %arg1: i32, %arg2: i32) -> (i32, i32) {
    %c0_i32 = arith.constant 0 : i32
    return %arg0, %arg1 : i32, i32
  }
}

</mosaic_0001>

<bundles_post_ra>
// kernel: tpu_custom_call.1
= control target key start
LH: loop header
LB: loop body
LE: loop exit
PB: predicated region body
PF: predicated region fallthrough
CT: control target
= control target key end

     0   :  { %vm51_vm0 = vcmask 261120   ;;  %s438_s0 = inlined_call_operand.vmem [shape: f32[16,32], index: 0, kind: input, shape index: {}]   ;;  %s439_s1 = inlined_call_operand.vmem [shape: f32[192,32], index: 1, kind: input, shape index: {}]   ;;  %s440_s2 = inlined_call_operand.hbm [shape: f32[16,192], index: 2, kind: output, shape index: {}]  }
   0x1   :  { %v42_v0 = vld [vmem:[%s439_s1 + $0x78] sm:$0xff]  ;;  %v41_v1 = vld [vmem:[%s439_s1 + $0x70] sm:$0xff] }
   0x2   :  { %242 = vmatpush.xpose.msk.msra.mxu2 %vm51_vm0, %v42_v0  ;;  %214 = vmatpush.xpose.msk.msra.mxu0 %vm51_vm0, %v42_v0  ;;  %v50_v2 = vld [vmem:[%s439_s1 + $0xb8] sm:$0xff]  ;;  %v49_v3 = vld [vmem:[%s439_s1 + $0xb0] sm:$0xff] }
   0x3   :  { %232 = vmatpush.xpose.msk.msra.mxu1 %vm51_vm0, %v50_v2 }
   0x4   :  { %7 = vsyncpa [#allocation4], 0  ;;  %v40_v4 = vld [vmem:[%s439_s1 + $0x68] sm:$0xff]  ;;  %v39_v6 = vld [vmem:[%s439_s1 + $0x60] sm:$0xff]  ;;  %vm17_vm1 = vcmask 523264   ;;  %v288_v18 = vmov 0.0  }
   0x5   :  { %v48_v5 = vld [vmem:[%s439_s1 + $0xa8] sm:$0xff]  ;;  %v47_v7 = vld [vmem:[%s439_s1 + $0xa0] sm:$0xff]  ;;  %v38_v8 = vld [vmem:[%s439_s1 + $0x58] sm:$0xff]  ;;  %18 = vst.msk [vmem:[#allocation2 + $0x8] sm:$0xff] %vm17_vm1, %v288_v18  ;;  %s202_s7 = sshll.u32 %s440_s2, 4  ;;  %s290_s8 = smov 256   ;;  %s203_s7 = int_to_ptr.hbm [resolvable:$true] %s202_s7 }
   0x6   :  { %243 = vmatpush.xpose.msk.msra.mxu2 %vm51_vm0, %v41_v1  ;;  %215 = vmatpush.xpose.msk.msra.mxu0 %vm51_vm0, %v41_v1  ;;  %v46_v9 = vld [vmem:[%s439_s1 + $0x98] sm:$0xff]  ;;  %v37_v10 = vld [vmem:[%s439_s1 + $0x50] sm:$0xff]  ;;  %v36_v12 = vld [vmem:[%s439_s1 + $0x48] sm:$0xff]  ;;  %20 = vst.msk [vmem:[#allocation2 + $0x18] sm:$0xff] %vm17_vm1, %v288_v18  ;;  %s291_s9 = smov 16  }
   0x7   :  { %233 = vmatpush.xpose.msk.msra.mxu1 %vm51_vm0, %v49_v3  ;;  %v45_v11 = vld [vmem:[%s439_s1 + $0x90] sm:$0xff]  ;;  %v44_v13 = vld [vmem:[%s439_s1 + $0x88] sm:$0xff]  ;;  %v35_v14 = vld [vmem:[%s439_s1 + $0x40] sm:$0xff] }
   0x8   :  { %v43_v15 = vld [vmem:[%s439_s1 + $0x80] sm:$0xff]  ;;  %v34_v16 = vld [vmem:[%s439_s1 + $0x38] sm:$0xff]  ;;  %v33_v19 = vld [vmem:[%s439_s1 + $0x30] sm:$0xff] }
   0x9   :  { %v25_v17 = vld [vmem:[%s438_s0] sm:$0xff]  ;;  %v32_v20 = vld [vmem:[%s439_s1 + $0x28] sm:$0xff]  ;;  %v30_v23 = vld [vmem:[%s439_s1 + $0x18] sm:$0xff] }
   0xa   :  { %244 = vmatpush.xpose.msk.msra.mxu2 %vm51_vm0, %v40_v4  ;;  %216 = vmatpush.xpose.msk.msra.mxu0 %vm51_vm0, %v40_v4  ;;  %v26_v21 = vld [vmem:[%s438_s0 + $0x8] sm:$0xff]  ;;  %v31_v22 = vld [vmem:[%s439_s1 + $0x20] sm:$0xff]  ;;  %v29_v24 = vld [vmem:[%s439_s1 + $0x10] sm:$0xff] }
   0xb   :  { %234 = vmatpush.xpose.msk.msra.mxu1 %vm51_vm0, %v48_v5  ;;  %v28_v25 = vld [vmem:[%s439_s1 + $0x8] sm:$0xff]  ;;  %v27_v26 = vld [vmem:[%s439_s1] sm:$0xff]  ;;  %s289_s1 = smov [#allocation3]  }
   0xc   :  { %v22_v27 = vld [vmem:[#allocation2 + $0x8] sm:$0xff]  ;;  %s200_s4 = sshll.u32 %s289_s1, 4  ;;  %s201_s4 = int_to_ptr.vmem [resolvable:$true] %s200_s4 }
   0xd   :  { %v24_v30 = vld [vmem:[#allocation2 + $0x18] sm:$0xff] }
   0xe   :  { %245 = vmatpush.xpose.msk.msra.mxu2 %vm51_vm0, %v39_v6  ;;  %217 = vmatpush.xpose.msk.msra.mxu0 %vm51_vm0, %v39_v6 }
   0xf   :  { %235 = vmatpush.xpose.msk.msra.mxu1 %vm51_vm0, %v47_v7 }
  0x12   :  { %246 = vmatpush.xpose.msk.msra.mxu2 %vm51_vm0, %v38_v8  ;;  %218 = vmatpush.xpose.msk.msra.mxu0 %vm51_vm0, %v38_v8 }
  0x13   :  { %236 = vmatpush.xpose.msk.msra.mxu1 %vm51_vm0, %v46_v9 }
  0x16   :  { %247 = vmatpush.xpose.msk.msra.mxu2 %vm51_vm0, %v37_v10  ;;  %219 = vmatpush.xpose.msk.msra.mxu0 %vm51_vm0, %v37_v10 }
  0x17   :  { %237 = vmatpush.xpose.msk.msra.mxu1 %vm51_vm0, %v45_v11 }
  0x1a   :  { %248 = vmatpush.xpose.msk.msra.mxu2 %vm51_vm0, %v36_v12  ;;  %220 = vmatpush.xpose.msk.msra.mxu0 %vm51_vm0, %v36_v12 }
  0x1b   :  { %238 = vmatpush.xpose.msk.msra.mxu1 %vm51_vm0, %v44_v13 }
  0x1e   :  { %249 = vmatpush.xpose.msk.msra.mxu2 %vm51_vm0, %v35_v14  ;;  %221 = vmatpush.xpose.msk.msra.mxu0 %vm51_vm0, %v35_v14 }
  0x1f   :  { %239 = vmatpush.xpose.msk.msra.mxu1 %vm51_vm0, %v43_v15 }
  0x22   :  { %250 = vmatpush.xpose.msk.msra.mxu2 %vm51_vm0, %v34_v16  ;;  %222 = vmatpush.xpose.msk.msra.mxu0 %vm51_vm0, %v34_v16 }
  0x23   :  { %240 = vmatmul.msk.f32.vlgmr.msra.gmra.mxu1 %vm51_vm0, %v25_v17 }
  0x26   :  { %251 = vmatpush.xpose.msk.msra.mxu2 %vm51_vm0, %v33_v19  ;;  %223 = vmatpush.xpose.msk.msra.mxu0 %vm51_vm0, %v33_v19 }
  0x2a   :  { %252 = vmatpush.xpose.msk.msra.mxu2 %vm51_vm0, %v32_v20  ;;  %224 = vmatpush.xpose.msk.msra.mxu0 %vm51_vm0, %v32_v20 }
  0x2b   :  { %241 = vmatmul.msk.f32.gmra.mxu1 %vm51_vm0, %v26_v21 }
  0x2e   :  { %253 = vmatpush.xpose.msk.msra.mxu2 %vm51_vm0, %v31_v22  ;;  %225 = vmatpush.xpose.msk.msra.mxu0 %vm51_vm0, %v31_v22 }
  0x32   :  { %254 = vmatpush.xpose.msk.msra.mxu2 %vm51_vm0, %v30_v23  ;;  %226 = vmatpush.xpose.msk.msra.mxu0 %vm51_vm0, %v30_v23 }
  0x36   :  { %255 = vmatpush.xpose.msk.msra.mxu2 %vm51_vm0, %v29_v24  ;;  %227 = vmatpush.xpose.msk.msra.mxu0 %vm51_vm0, %v29_v24 }
  0x3a   :  { %256 = vmatpush.xpose.msk.msra.mxu2 %vm51_vm0, %v28_v25  ;;  %228 = vmatpush.xpose.msk.msra.mxu0 %vm51_vm0, %v28_v25 }
  0x3e   :  { %257 = vmatpush.xpose.msk.msra.mxu2 %vm51_vm0, %v27_v26  ;;  %229 = vmatpush.xpose.msk.msra.mxu0 %vm51_vm0, %v27_v26 }
  0x41   :  { %231 = vmatmul.msk.f32.vlgmr.msra.gmra.mxu2 %vm51_vm0, %v26_v21  ;;  %230 = vmatmul.msk.f32.vlgmr.msra.gmra.mxu0 %vm51_vm0, %v25_v17 }
  0xa0   :  { %v170_v28 = vpop.f32.mrf.mxu1 }
  0xa1   :  { %v177_v29 = vadd.f32 %v170_v28, %v22_v27 }
  0xa3   :  { %182 = vst.msk [vmem:[#allocation2 + $0x8] sm:$0xff] %vm17_vm1, %v177_v29 }
  0xa8   :  { %v173_v31 = vpop.f32.mrf.mxu1 }
  0xa9   :  { %v179_v32 = vadd.f32 %v173_v31, %v24_v30 }
  0xaa   :  { %v189_v33 = vld [vmem:[#allocation2 + $0x8] sm:$0xff] }
  0xab   :  { %184 = vst.msk [vmem:[#allocation2 + $0x18] sm:$0xff] %vm17_vm1, %v179_v32 }
  0xac   :  { %193 = vst.msk [vmem:[#allocation3 + $0x8] sm:$0xff] %vm17_vm1, %v189_v33 }
  0xb2   :  { %v191_v34 = vld [vmem:[#allocation2 + $0x18] sm:$0xff] }
  0xb3   :  { %195 = vst.msk [vmem:[#allocation3 + $0x18] sm:$0xff] %vm17_vm1, %v191_v34 }
  0xbe   :  { %v147_v35 = vpop.f32.mrf.mxu0 }
  0xbf   :  { %192 = vst [vmem:[#allocation3] sm:$0xff] %v147_v35 }
  0xc4   :  { %v150_v36 = vpop.f32.mrf.mxu2 }
  0xc5   :  { %194 = vst [vmem:[#allocation3 + $0x10] sm:$0xff] %v150_v36 }
  0xc6   :  { %208 = dma.vmem_to_hbm [thread:$0]  %s201_s4, 512, %s203_s7, [#allocation4], %s290_s8, %s290_s8, %s291_s9  }
  0xc7   :  { %286 = dma.done.wait [#allocation4], 512  }
  0xc8   :  { %287 = vsyncadd [#allocation4], 4294966784 }
  0xc9   :  { %213 = vsyncpa [#allocation4], 1 }

</bundles_post_ra>
